<compile_context>
chip_gen: v5e
topology: v5e:2x2
jax: 0.10.0
libtpu: 0.0.40
codegen_flags: <defaults>
</compile_context>

<pallas_src>
import math
from functools import partial

import numpy as np
import jax
import jax.numpy as jnp
from jax.experimental import pallas as pl
from jax.experimental.pallas import tpu as pltpu

# ----------------------------- configuration --------------------------------
NINF_VALUE = -9999
MASK_THRESHOLD = 0.5

IMG_SIZE = 64          # image_encoder.img_size
PATCH = 16             # ViT patch size -> embedding grid 4x4
N_PATCH = IMG_SIZE // PATCH
ENC_DIM = 32
ENC_HEADS = 2
ENC_MLP = 64
ENC_DEPTH = 2          # TODO(synk): real VistaImageEncoderViT uses many more blocks
PROMPT_DIM = 16        # prompt / transformer embedding dim
EMB_H = EMB_W = N_PATCH
TDIM = PROMPT_DIM
DEC_HEADS = 2
DEC_MLP = 32
DEC_DEPTH = 2
NUM_MASK_TOKENS = 4    # num_multimask_outputs=3 -> 3+1
IOU_HIDDEN = 32
LOW_RES = IMG_SIZE // 4   # 16


# ----------------------------- small helpers ---------------------------------
def _full_spec(shape):
    """Full-array block, constant across a rank-1 grid."""
    nd = len(shape)
    return pl.BlockSpec(tuple(shape), lambda i, n=nd: (0,) * n)


def _row_spec(shape):
    """Block over the leading axis (one slice per grid step), full otherwise."""
    nd = len(shape)
    return pl.BlockSpec((1,) + tuple(shape[1:]),
                        lambda i, n=nd: (i,) + (0,) * (n - 1))


def _ln(x, g, b, eps):
    mu = jnp.mean(x, axis=-1, keepdims=True)
    var = jnp.mean((x - mu) ** 2, axis=-1, keepdims=True)
    return (x - mu) * jax.lax.rsqrt(var + eps) * g + b


def _act(x, kind):
    if kind is None:
        return x
    if kind == 'gelu':
        return jax.nn.gelu(x, approximate=True)
    if kind == 'relu':
        return jnp.maximum(x, 0.0)
    raise ValueError(kind)


def _softmax_rows(s):
    m = jnp.max(s, axis=-1, keepdims=True)
    e = jnp.exp(s - m)
    return e * pl.reciprocal(jnp.sum(e, axis=-1, keepdims=True), approx=True)


def _dot(a, b):
    return jnp.dot(a, b, preferred_element_type=jnp.float32)


def _dot_nt(a, b):
    # a (M, K) contracted with b (N, K) over K -> (M, N), no explicit transpose
    return jax.lax.dot_general(a, b, (((1,), (1,)), ((), ())),
                               preferred_element_type=jnp.float32)


def _interp_matrix(in_size, out_size):
    # matches F.interpolate(..., mode='bilinear', align_corners=False)
    out_idx = jnp.arange(out_size, dtype=jnp.float32)
    scale = in_size / out_size
    src = (out_idx + 0.5) * scale - 0.5
    src = jnp.clip(src, 0.0, in_size - 1)
    lo = jnp.floor(src).astype(jnp.int32)
    hi = jnp.minimum(lo + 1, in_size - 1)
    w_hi = src - lo.astype(jnp.float32)
    w_lo = 1.0 - w_hi
    m = (jax.nn.one_hot(lo, in_size, dtype=jnp.float32) * w_lo[:, None]
         + jax.nn.one_hot(hi, in_size, dtype=jnp.float32) * w_hi[:, None])
    return m  # (out, in)


# ----------------------------- Pallas kernels --------------------------------
def _linear_kernel(*refs, do_ln, eps, pre_act, post_act, has_bias):
    """Optional LN -> optional pre-activation -> matmul -> bias -> activation."""
    o_ref = refs[-1]
    it = iter(refs[:-1])
    x = next(it)[...]
    if do_ln:
        x = x.astype(jnp.float32)
        g = next(it)[...]
        b = next(it)[...]
        x = _ln(x, g, b, eps)
    x = _act(x, pre_act)
    w = next(it)[...]
    y = _dot(x.astype(w.dtype), w)
    if has_bias:
        y = y + next(it)[...]
    o_ref[...] = _act(y, post_act)


def _vit_block_kernel(x_ref, ln1g, ln1b, wqkv, bqkv, wproj, bproj,
                      ln2g, ln2b, w1, b1, w2, b2, o_ref, *, heads, eps):
    """One full ViT block (one batch element per grid step): LN1 + QKV + MHA +
    proj + residual + LN2 + MLP + residual, all in VMEM."""
    x = x_ref[0]                          # (N, D) f32
    N, D = x.shape
    dh = D // heads
    scale = 1.0 / math.sqrt(dh)
    xn = _ln(x, ln1g[...], ln1b[...], eps)
    wq = wqkv[...]                        # bf16 weights, f32 accumulation
    qkv = _dot(xn.astype(wq.dtype), wq) + bqkv[...]
    wp = wproj[...]
    attn = jnp.zeros((N, D), jnp.float32)
    for h in range(heads):                # static head loop, no concat / transposes
        q = qkv[:, h * dh:(h + 1) * dh] * scale
        k = qkv[:, D + h * dh:D + (h + 1) * dh]
        v = qkv[:, 2 * D + h * dh:2 * D + (h + 1) * dh]
        p = _softmax_rows(_dot_nt(q, k))
        o = _dot(p, v)
        attn = attn + _dot(o.astype(wp.dtype), wp[h * dh:(h + 1) * dh, :])
    x2 = x + attn + bproj[...]
    xn2 = _ln(x2, ln2g[...], ln2b[...], eps)
    w1v = w1[...]
    h1 = _act(_dot(xn2.astype(w1v.dtype), w1v) + b1[...], 'gelu')
    w2v = w2[...]
    o_ref[0] = x2 + _dot(h1.astype(w2v.dtype), w2v) + b2[...]


def _neck_kernel(x_ref, w1_ref, g1_ref, b1_ref, w3_ref, g2_ref, b2_ref,
                 o_ref, pad_ref, *, eps):
    """Encoder neck: 1x1 conv + LN + 3x3 conv (9-shift accumulate through a
    zero-padded VMEM scratch) + LayerNorm2d, fully fused. NHWC layout."""
    B, H, W, Cin = x_ref.shape
    w1 = w1_ref[...]
    Cout = w1.shape[1]
    x = x_ref[...].reshape(B * H * W, Cin)
    f = _ln(_dot(x, w1), g1_ref[...], b1_ref[...], eps)
    pad_ref[...] = jnp.zeros(pad_ref.shape, pad_ref.dtype)
    pad_ref[:, 1:H + 1, 1:W + 1, :] = f.reshape(B, H, W, Cout)
    w3 = w3_ref[...]                      # (9, Cout, Cout)
    acc = jnp.zeros((B * H * W, Cout), jnp.float32)
    for k in range(9):
        dy, dx = k // 3, k % 3
        patch = pad_ref[:, dy:dy + H, dx:dx + W, :].reshape(B * H * W, Cout)
        acc = acc + _dot(patch, w3[k])
    o_ref[...] = _ln(acc, g2_ref[...], b2_ref[...], eps).reshape(B, H, W, Cout)


def _dec_attn(q, k, v, ap, heads):
    """SAM decoder attention module (projections + MHA + output proj), operating
    on plain 2D arrays inside a kernel."""
    I = ap['q_w'].shape[1]
    dh = I // heads
    scale = 1.0 / math.sqrt(dh)
    q2 = _dot(q, ap['q_w']) + ap['q_b']
    k2 = _dot(k, ap['k_w']) + ap['k_b']
    v2 = _dot(v, ap['v_w']) + ap['v_b']
    out = jnp.zeros((q.shape[0], ap['out_w'].shape[1]), jnp.float32)
    for h in range(heads):
        qh = q2[:, h * dh:(h + 1) * dh] * scale
        kh = k2[:, h * dh:(h + 1) * dh]
        vh = v2[:, h * dh:(h + 1) * dh]
        p = _softmax_rows(_dot_nt(qh, kh))
        oh = _dot(p, vh)
        out = out + _dot(oh, ap['out_w'][h * dh:(h + 1) * dh, :])
    return out + ap['out_b']


def _twoway_kernel(*refs, treedef, n_leaves, heads):
    """Whole two-way transformer (all blocks + final attention + final norm) for
    ONE prompt per grid step; all weights and activations stay in VMEM."""
    tok_ref, src_ref, pe_ref = refs[0], refs[1], refs[2]
    p_refs = refs[3:3 + n_leaves]
    qo_ref, ko_ref = refs[3 + n_leaves], refs[4 + n_leaves]
    P = jax.tree_util.tree_unflatten(treedef, [r[...] for r in p_refs])

    query_pe = tok_ref[0]                 # (Nq, D) = point embedding
    key_pe = pe_ref[...]                  # (HW, D)
    queries = query_pe
    keys = src_ref[0]                     # (HW, D)
    for i, lp in enumerate(P['layers']):
        if i == 0:                        # skip_first_layer_pe
            queries = _dec_attn(queries, queries, queries, lp['self_attn'], heads)
        else:
            q = queries + query_pe
            queries = queries + _dec_attn(q, q, queries, lp['self_attn'], heads)
        queries = _ln(queries, lp['norm1_g'], lp['norm1_b'], 1e-5)
        q = queries + query_pe
        k = keys + key_pe
        queries = queries + _dec_attn(q, k, keys, lp['cross_t2i'], heads)
        queries = _ln(queries, lp['norm2_g'], lp['norm2_b'], 1e-5)
        h = jnp.maximum(_dot(queries, lp['mlp_w1']) + lp['mlp_b1'], 0.0)
        mlp = _dot(h, lp['mlp_w2']) + lp['mlp_b2']
        queries = _ln(queries + mlp, lp['norm3_g'], lp['norm3_b'], 1e-5)
        q = queries + query_pe
        k = keys + key_pe
        keys = keys + _dec_attn(k, q, queries, lp['cross_i2t'], heads)
        keys = _ln(keys, lp['norm4_g'], lp['norm4_b'], 1e-5)
    q = queries + query_pe
    k = keys + key_pe
    queries = queries + _dec_attn(q, k, keys, P['final_attn'], heads)
    queries = _ln(queries, P['norm_final_g'], P['norm_final_b'], 1e-5)
    qo_ref[0] = queries
    ko_ref[0] = keys


def _heads_kernel(mtok_ref, up_ref, itok_ref,
                  hw0, hb0, hw1, hb1, hw2, hb2,
                  iw0, ib0, iw1, ib1, iw2, ib2,
                  masks_ref, iou_ref, *, G):
    """All hypernetwork MLP heads + the K=2 mask projection (VPU FMA, no MXU)
    + the IoU head, in one launch. Mask output is lane-dense (256 lanes)."""
    mtok = mtok_ref[...]                  # (Bp, G, D)
    up = up_ref[...]                      # (Bp, C2, HWu)
    w0, b0 = hw0[...], hb0[...]
    w1, b1 = hw1[...], hb1[...]
    w2, b2 = hw2[...], hb2[...]
    C2 = w2.shape[2]
    for g in range(G):
        x = mtok[:, g, :]                                     # (Bp, D)
        h = jnp.maximum(_dot(x, w0[g]) + b0[g], 0.0)
        h = jnp.maximum(_dot(h, w1[g]) + b1[g], 0.0)
        w = _dot(h, w2[g]) + b2[g]                            # (Bp, C2)
        m = w[:, 0:1] * up[:, 0, :]
        for c in range(1, C2):
            m = m + w[:, c:c + 1] * up[:, c, :]
        masks_ref[:, g, :] = m
    xi = itok_ref[...]                                        # (Bp, D)
    h = jnp.maximum(_dot(xi, iw0[...]) + ib0[...], 0.0)
    h = jnp.maximum(_dot(h, iw1[...]) + ib1[...], 0.0)
    iou_ref[...] = _dot(h, iw2[...]) + ib2[...]


def _preproc_kernel(x_ref, wh_ref, wwt_ref, mean_ref, istd_ref, o_ref,
                    *, valid_h, valid_w):
    """Per image plane: masked pixel-normalize (padded region stays 0) and
    bilinear resize to IMG_SIZE. mean/1-over-std are SMEM scalars."""
    p = pl.program_id(0)
    x = x_ref[0]                          # (T, T)
    T = x.shape[0]
    row = jax.lax.broadcasted_iota(jnp.int32, (T, T), 0)
    col = jax.lax.broadcasted_iota(jnp.int32, (T, T), 1)
    mask = ((row < valid_h) & (col < valid_w)).astype(jnp.float32)
    xn = (x - mean_ref[p] * mask) * istd_ref[p]
    t = _dot(wh_ref[...], xn)
    o_ref[0] = _dot(t, wwt_ref[...])


def _postproc_kernel(x_ref, wh1, ww1t, wh2, ww2t, o_ref):
    """Per mask plane: chained bilinear resize low_res -> IMG_SIZE -> max(size)."""
    x = x_ref[0]
    t = _dot(_dot(wh1[...], x), ww1t[...])
    o_ref[0] = _dot(_dot(wh2[...], t), ww2t[...])


# ----------------------------- Pallas wrappers --------------------------------
def _linear_call(x, w, b=None, ln=None, pre_act=None, post_act=None):
    R = x.shape[0]
    N = w.shape[1]
    args = [x]
    do_ln = ln is not None
    eps = 1e-6
    if do_ln:
        g, bb, eps = ln
        args += [g.reshape(1, -1).astype(jnp.float32),
                 bb.reshape(1, -1).astype(jnp.float32)]
    args.append(w)
    has_bias = b is not None
    if has_bias:
        args.append(b.reshape(1, -1).astype(jnp.float32))
    kern = partial(_linear_kernel, do_ln=do_ln, eps=eps, pre_act=pre_act,
                   post_act=post_act, has_bias=has_bias)
    return pl.pallas_call(
        kern,
        grid=(1,),
        in_specs=[_full_spec(a.shape) for a in args],
        out_specs=_full_spec((R, N)),
        out_shape=jax.ShapeDtypeStruct((R, N), jnp.float32),
    )(*args)


def _vit_block_call(x, bp):
    B, N, D = x.shape
    bf = jnp.bfloat16
    args = [x,
            bp['ln1_g'].reshape(1, D), bp['ln1_b'].reshape(1, D),
            bp['qkv_w'].astype(bf), bp['qkv_b'].reshape(1, 3 * D),
            bp['proj_w'].astype(bf), bp['proj_b'].reshape(1, D),
            bp['ln2_g'].reshape(1, D), bp['ln2_b'].reshape(1, D),
            bp['mlp_w1'].astype(bf), bp['mlp_b1'].reshape(1, -1),
            bp['mlp_w2'].astype(bf), bp['mlp_b2'].reshape(1, D)]
    in_specs = [_row_spec(x.shape)] + [_full_spec(a.shape) for a in args[1:]]
    return pl.pallas_call(
        partial(_vit_block_kernel, heads=ENC_HEADS, eps=1e-6),
        grid=(B,),
        in_specs=in_specs,
        out_specs=_row_spec((B, N, D)),
        out_shape=jax.ShapeDtypeStruct((B, N, D), jnp.float32),
        compiler_params=pltpu.CompilerParams(dimension_semantics=("parallel",)),
    )(*args)


def _neck_call(feat, ep):
    B, H, W, _ = feat.shape
    Cout = ep['neck_conv1'].shape[1]
    args = [feat, ep['neck_conv1'],
            ep['neck_ln1_g'].reshape(1, -1), ep['neck_ln1_b'].reshape(1, -1),
            ep['neck_conv2'],
            ep['neck_ln2_g'].reshape(1, -1), ep['neck_ln2_b'].reshape(1, -1)]
    return pl.pallas_call(
        partial(_neck_kernel, eps=1e-6),
        grid=(1,),
        in_specs=[_full_spec(a.shape) for a in args],
        out_specs=_full_spec((B, H, W, Cout)),
        out_shape=jax.ShapeDtypeStruct((B, H, W, Cout), jnp.float32),
        scratch_shapes=[pltpu.VMEM((B, H + 2, W + 2, Cout), jnp.float32)],
    )(*args)


def _twoway_call(tokens, src, key_pe, tparams):
    Bp, Nq, D = tokens.shape
    HW = src.shape[1]
    p2 = jax.tree_util.tree_map(
        lambda a: a.reshape(1, -1) if a.ndim == 1 else a, tparams)
    leaves, treedef = jax.tree_util.tree_flatten(p2)
    n = len(leaves)
    kern = partial(_twoway_kernel, treedef=treedef, n_leaves=n, heads=DEC_HEADS)
    in_specs = ([_row_spec(tokens.shape), _row_spec(src.shape),
                 _full_spec(key_pe.shape)]
                + [_full_spec(a.shape) for a in leaves])
    out_shape = (jax.ShapeDtypeStruct((Bp, Nq, D), jnp.float32),
                 jax.ShapeDtypeStruct((Bp, HW, D), jnp.float32))
    out_specs = (_row_spec((Bp, Nq, D)), _row_spec((Bp, HW, D)))
    return pl.pallas_call(
        kern,
        grid=(Bp,),
        in_specs=in_specs,
        out_specs=out_specs,
        out_shape=out_shape,
        compiler_params=pltpu.CompilerParams(dimension_semantics=("parallel",)),
    )(tokens, src, key_pe, *leaves)


def _heads_call(mask_tokens_out, up_flat, iou_token_out, dp):
    Bp, G, _ = mask_tokens_out.shape
    HWu = up_flat.shape[2]
    hp, ip = dp['hyper'], dp['iou_head']
    args = [mask_tokens_out, up_flat, iou_token_out,
            hp['w0'], hp['b0'], hp['w1'], hp['b1'], hp['w2'], hp['b2'],
            ip['w0'], ip['b0'].reshape(1, -1),
            ip['w1'], ip['b1'].reshape(1, -1),
            ip['w2'], ip['b2'].reshape(1, -1)]
    out_shape = (jax.ShapeDtypeStruct((Bp, G, HWu), jnp.float32),
                 jax.ShapeDtypeStruct((Bp, ip['w2'].shape[1]), jnp.float32))
    return pl.pallas_call(
        partial(_heads_kernel, G=G),
        grid=(1,),
        in_specs=[_full_spec(a.shape) for a in args],
        out_specs=tuple(_full_spec(s.shape) for s in out_shape),
        out_shape=out_shape,
    )(*args)


# ----------------------------- pre / post process ----------------------------
@jax.jit
def _preprocess_jit(x, mean, std):
    B, C, H, W = x.shape
    T = max(H, W)
    xp = jnp.pad(x.astype(jnp.float32),
                 ((0, 0), (0, 0), (0, T - H), (0, T - W))).reshape(B * C, T, T)
    mean_p = jnp.tile(mean.astype(jnp.float32), B)        # (B*C,)
    istd_p = jnp.tile(1.0 / std.astype(jnp.float32), B)
    wh = _interp_matrix(T, IMG_SIZE)
    wwt = _interp_matrix(T, IMG_SIZE).T
    out = pl.pallas_call(
        partial(_preproc_kernel, valid_h=H, valid_w=W),
        grid=(B * C,),
        in_specs=[_row_spec(xp.shape),
                  _full_spec(wh.shape), _full_spec(wwt.shape),
                  pl.BlockSpec(memory_space=pltpu.MemorySpace.SMEM),
                  pl.BlockSpec(memory_space=pltpu.MemorySpace.SMEM)],
        out_specs=_row_spec((B * C, IMG_SIZE, IMG_SIZE)),
        out_shape=jax.ShapeDtypeStruct((B * C, IMG_SIZE, IMG_SIZE), jnp.float32),
        compiler_params=pltpu.CompilerParams(dimension_semantics=("parallel",)),
    )(xp, wh, wwt, mean_p, istd_p)
    return out.reshape(B, C, IMG_SIZE, IMG_SIZE)


def preprocess_batch(batched_input, params):
    imgs = [jnp.asarray(rec['image'], jnp.float32) for rec in batched_input]
    if len({tuple(im.shape) for im in imgs}) == 1:
        return _preprocess_jit(jnp.stack(imgs, 0),
                               params['pixel_mean'], params['pixel_std'])
    return jnp.concatenate(
        [_preprocess_jit(im[None], params['pixel_mean'], params['pixel_std'])
         for im in imgs], axis=0)


@partial(jax.jit, static_argnames=("oh", "ow"))
def _postproc_jit(masks, *, oh, ow):
    B, C, H, W = masks.shape
    x = masks.astype(jnp.float32).reshape(B * C, H, W)
    maxs = max(oh, ow)
    wh1 = _interp_matrix(H, IMG_SIZE)
    ww1t = _interp_matrix(W, IMG_SIZE).T
    wh2 = _interp_matrix(IMG_SIZE, maxs)
    ww2t = _interp_matrix(IMG_SIZE, maxs).T
    out = pl.pallas_call(
        _postproc_kernel,
        grid=(B * C,),
        in_specs=[_row_spec(x.shape),
                  _full_spec(wh1.shape), _full_spec(ww1t.shape),
                  _full_spec(wh2.shape), _full_spec(ww2t.shape)],
        out_specs=_row_spec((B * C, maxs, maxs)),
        out_shape=jax.ShapeDtypeStruct((B * C, maxs, maxs), jnp.float32),
        compiler_params=pltpu.CompilerParams(dimension_semantics=("parallel",)),
    )(x, wh1, ww1t, wh2, ww2t)
    out = out.reshape(B, C, maxs, maxs)[..., :oh, :ow]
    return out.astype(jnp.float16)


# ----------------------------- image encoder ---------------------------------
@jax.jit
def _encode_jit(x, ep):
    B = x.shape[0]
    patches = (x.reshape(B, 3, N_PATCH, PATCH, N_PATCH, PATCH)
                 .transpose(0, 2, 4, 1, 3, 5)
                 .reshape(B * N_PATCH * N_PATCH, 3 * PATCH * PATCH))
    tok = _linear_call(patches.astype(jnp.bfloat16),
                       ep['patch_w'].astype(jnp.bfloat16), ep['patch_b'])
    tok = tok.reshape(B, N_PATCH, N_PATCH, ENC_DIM) + ep['pos_embed']
    h = tok.reshape(B, N_PATCH * N_PATCH, ENC_DIM)
    # TODO(synk): windowed attention / relative position bias of the real ViT omitted.
    for bp in ep['blocks']:
        h = _vit_block_call(h, bp)
    feat = h.reshape(B, N_PATCH, N_PATCH, ENC_DIM)            # NHWC
    f = _neck_call(feat, ep)                                  # (B, 4, 4, PROMPT_DIM)
    return f.transpose(0, 3, 1, 2)                            # (B, PROMPT_DIM, 4, 4)


# ----------------------------- prompt encoder --------------------------------
def pe_encoding(coords, gauss):
    shp = coords.shape
    c = coords.reshape(-1, 2).astype(jnp.float32) * 2.0 - 1.0
    c = 2.0 * jnp.pi * (c @ gauss)
    out = jnp.concatenate([jnp.sin(c), jnp.cos(c)], axis=-1)
    return out.reshape(*shp[:-1], 2 * gauss.shape[1])


def get_dense_pe(p):
    y = (jnp.arange(EMB_H, dtype=jnp.float32) + 0.5) / EMB_H
    x = (jnp.arange(EMB_W, dtype=jnp.float32) + 0.5) / EMB_W
    yy, xx = jnp.meshgrid(y, x, indexing='ij')
    pe = pe_encoding(jnp.stack([xx, yy], axis=-1), p['pe_gauss'])
    return pe.transpose(2, 0, 1)[None]                        # (1, C, h, w)


def prompt_encoder_fn(coords, labels, p):
    coords = coords.astype(jnp.float32)
    labels = labels.astype(jnp.int32)
    bs = coords.shape[0]
    coords = jnp.concatenate([coords + 0.5, jnp.zeros((bs, 1, 2), jnp.float32)], 1)
    labels = jnp.concatenate([labels, -jnp.ones((bs, 1), jnp.int32)], 1)
    norm = coords / jnp.array([IMG_SIZE, IMG_SIZE], jnp.float32)
    emb = pe_encoding(norm, p['pe_gauss'])
    lab = labels[..., None]
    emb = jnp.where(lab == -1, 0.0, emb)
    emb = jnp.where(lab == -1, emb + p['not_a_point'][None, None], emb)
    emb = jnp.where(lab == 0, emb + p['point_emb0'][None, None], emb)
    emb = jnp.where(lab == 1, emb + p['point_emb1'][None, None], emb)
    dense = jnp.broadcast_to(p['no_mask_embed'].reshape(1, -1, 1, 1),
                             (bs, PROMPT_DIM, EMB_H, EMB_W))
    return emb, dense


# ----------------------------- mask decoder ----------------------------------
@partial(jax.jit, static_argnames=("multimask_output",))
def _decode_jit(coords, labels, src_img, pp, dp, *, multimask_output):
    sparse, dense = prompt_encoder_fn(coords, labels, pp)
    image_pe = get_dense_pe(pp)
    Bp = sparse.shape[0]
    out_tok = jnp.concatenate([dp['iou_token'], dp['mask_tokens']], axis=0)
    tokens = jnp.concatenate(
        [jnp.broadcast_to(out_tok[None], (Bp,) + out_tok.shape), sparse], axis=1)
    src = src_img + dense
    src_seq = src.reshape(Bp, PROMPT_DIM, EMB_H * EMB_W).transpose(0, 2, 1)
    key_pe = image_pe.reshape(PROMPT_DIM, EMB_H * EMB_W).T

    hs, src2 = _twoway_call(tokens, src_seq, key_pe, dp['transformer'])
    iou_token_out = hs[:, 0, :]
    mask_tokens_out = hs[:, 1:1 + NUM_MASK_TOKENS, :]

    # upscaling: ConvT(2,2) -> LN2d -> GELU -> ConvT(2,2) -> GELU (NHWC, channel
    # matmuls in Pallas, pixel-shuffle reshapes as cheap XLA glue)
    C1, C2 = TDIM // 4, TDIM // 8
    x4 = src2.reshape(Bp, EMB_H, EMB_W, PROMPT_DIM)
    y1 = _linear_call(x4.reshape(Bp * EMB_H * EMB_W, PROMPT_DIM),
                      dp['up1_w'].reshape(PROMPT_DIM, C1 * 4),
                      jnp.repeat(dp['up1_b'], 4))
    sp1 = (y1.reshape(Bp, EMB_H, EMB_W, C1, 2, 2)
             .transpose(0, 1, 4, 2, 5, 3)
             .reshape(Bp, 2 * EMB_H, 2 * EMB_W, C1))
    y2 = _linear_call(sp1.reshape(Bp * 4 * EMB_H * EMB_W, C1),
                      dp['up2_w'].reshape(C1, C2 * 4),
                      jnp.repeat(dp['up2_b'], 4),
                      ln=(dp['up_ln_g'], dp['up_ln_b'], 1e-6),
                      pre_act='gelu', post_act='gelu')
    up = (y2.reshape(Bp, 2 * EMB_H, 2 * EMB_W, C2, 2, 2)
            .transpose(0, 1, 4, 2, 5, 3)
            .reshape(Bp, 4 * EMB_H, 4 * EMB_W, C2))
    up_flat = up.transpose(0, 3, 1, 2).reshape(Bp, C2, 16 * EMB_H * EMB_W)

    masks, iou_pred = _heads_call(mask_tokens_out, up_flat, iou_token_out, dp)
    masks = masks.reshape(Bp, NUM_MASK_TOKENS, 4 * EMB_H, 4 * EMB_W)
    sl = slice(1, None) if multimask_output else slice(0, 1)
    return masks[:, sl], iou_pred[:, sl]


# ----------------------------- Vista2D forward -------------------------------
def vista2d_forward(batched_input, params, multimask_output=False, is_train=False):
    input_images = preprocess_batch(batched_input, params)
    image_embeddings = _encode_jit(input_images, params['encoder'])

    # host-side (data-dependent) valid-prompt selection, then ONE batched decode.
    # TODO(synk): boolean-mask gather has no static-shape Pallas equivalent.
    valids = []
    for rec in batched_input:
        plbl = np.asarray(rec['point_labels'])
        valids.append(np.where((plbl != -1).sum(1) > 0)[0])
    n_valid = [int(v.size) for v in valids]
    total = sum(n_valid)

    masks_all = iou_all = None
    if total > 0:
        pc = np.concatenate([np.asarray(rec['point_coords'])[v]
                             for rec, v in zip(batched_input, valids) if v.size > 0], 0)
        plb = np.concatenate([np.asarray(rec['point_labels'])[v]
                              for rec, v in zip(batched_input, valids) if v.size > 0], 0)
        src_img = jnp.concatenate(
            [jnp.repeat(image_embeddings[i:i + 1], n, axis=0)
             for i, n in enumerate(n_valid) if n > 0], axis=0)
        masks_all, iou_all = _decode_jit(
            jnp.asarray(pc, jnp.float32), jnp.asarray(plb, jnp.int32),
            src_img, params['prompt'], params['decoder'],
            multimask_output=multimask_output)

    low_list, iou_list = [], []
    off = 0
    for i, rec in enumerate(batched_input):
        bs = np.asarray(rec['point_coords']).shape[0]
        nm = masks_all.shape[1] if masks_all is not None else 1
        low = jnp.full((bs, nm, LOW_RES, LOW_RES), NINF_VALUE, dtype=jnp.float16)
        iou = 0   # reference keeps the Python int 0 when a record has no valid prompt
        v = valids[i]
        if v.size > 0:
            n = int(v.size)
            low = low.at[v].set(masks_all[off:off + n].astype(jnp.float16))
            iou = iou_all[off:off + n]
            off += n
        low_list.append(low)
        iou_list.append(iou)

    if is_train:
        return [{'iou_predictions': iou_list[i], 'low_res_logits': low_list[i]}
                for i in range(len(batched_input))]

    # bucket postprocess by original_size: one resize launch / compile per bucket
    buckets = {}
    for i, rec in enumerate(batched_input):
        buckets.setdefault(tuple(int(s) for s in rec['original_size']), []).append(i)
    high_map = {}
    for (oh, ow), idxs in buckets.items():
        cat = jnp.concatenate([low_list[i] for i in idxs], axis=0)
        hr = _postproc_jit(cat, oh=oh, ow=ow)
        o2 = 0
        for i in idxs:
            n_i = low_list[i].shape[0]
            high_map[i] = hr[o2:o2 + n_i]
            o2 += n_i

    outputs = []
    for i in range(len(batched_input)):
        high = high_map[i]
        outputs.append({'masks': high > MASK_THRESHOLD,
                        'iou_predictions': iou_list[i],
                        'low_res_logits': low_list[i],
                        'high_res_logits': high})
    return outputs


# ----------------------------- parameters ------------------------------------
def init_params(key):
    keys = iter(jax.random.split(key, 256))

    def nrm(shape, scale=0.02):
        return scale * jax.random.normal(next(keys), shape, jnp.float32)

    P = {'pixel_mean': jnp.array([123.675, 116.28, 103.53], jnp.float32),
         'pixel_std': jnp.array([58.395, 57.12, 57.375], jnp.float32)}

    enc = {'patch_w': nrm((3 * PATCH * PATCH, ENC_DIM)),
           'patch_b': jnp.zeros((ENC_DIM,), jnp.float32),
           'pos_embed': nrm((1, N_PATCH, N_PATCH, ENC_DIM)),
           'neck_conv1': nrm((ENC_DIM, PROMPT_DIM)),
           'neck_ln1_g': jnp.ones((PROMPT_DIM,)), 'neck_ln1_b': jnp.zeros((PROMPT_DIM,)),
           'neck_conv2': nrm((9, PROMPT_DIM, PROMPT_DIM)),
           'neck_ln2_g': jnp.ones((PROMPT_DIM,)), 'neck_ln2_b': jnp.zeros((PROMPT_DIM,)),
           'blocks': []}
    for _ in range(ENC_DEPTH):
        enc['blocks'].append({
            'ln1_g': jnp.ones((ENC_DIM,)), 'ln1_b': jnp.zeros((ENC_DIM,)),
            'qkv_w': nrm((ENC_DIM, 3 * ENC_DIM)), 'qkv_b': jnp.zeros((3 * ENC_DIM,)),
            'proj_w': nrm((ENC_DIM, ENC_DIM)), 'proj_b': jnp.zeros((ENC_DIM,)),
            'ln2_g': jnp.ones((ENC_DIM,)), 'ln2_b': jnp.zeros((ENC_DIM,)),
            'mlp_w1': nrm((ENC_DIM, ENC_MLP)), 'mlp_b1': jnp.zeros((ENC_MLP,)),
            'mlp_w2': nrm((ENC_MLP, ENC_DIM)), 'mlp_b2': jnp.zeros((ENC_DIM,))})
    P['encoder'] = enc

    P['prompt'] = {'pe_gauss': jax.random.normal(next(keys), (2, PROMPT_DIM // 2),
                                                 jnp.float32),
                   'not_a_point': nrm((PROMPT_DIM,)),
                   'point_emb0': nrm((PROMPT_DIM,)),
                   'point_emb1': nrm((PROMPT_DIM,)),
                   'no_mask_embed': nrm((PROMPT_DIM,))}

    def attn_params(dim, internal):
        return {'q_w': nrm((dim, internal)), 'q_b': jnp.zeros((internal,)),
                'k_w': nrm((dim, internal)), 'k_b': jnp.zeros((internal,)),
                'v_w': nrm((dim, internal)), 'v_b': jnp.zeros((internal,)),
                'out_w': nrm((internal, dim)), 'out_b': jnp.zeros((dim,))}

    def mlp3_grouped(G, din, dh_, dout):
        # weights stored as (G, in, out): contraction dim in the sublane axis
        return {'w0': nrm((G, din, dh_)), 'b0': jnp.zeros((G, 1, dh_), jnp.float32),
                'w1': nrm((G, dh_, dh_)), 'b1': jnp.zeros((G, 1, dh_), jnp.float32),
                'w2': nrm((G, dh_, dout)), 'b2': jnp.zeros((G, 1, dout), jnp.float32)}

    def mlp3(din, dh_, dout):
        return {'w0': nrm((din, dh_)), 'b0': jnp.zeros((dh_,)),
                'w1': nrm((dh_, dh_)), 'b1': jnp.zeros((dh_,)),
                'w2': nrm((dh_, dout)), 'b2': jnp.zeros((dout,))}

    layers = []
    for _ in range(DEC_DEPTH):
        layers.append({
            'self_attn': attn_params(TDIM, TDIM),
            'norm1_g': jnp.ones((TDIM,)), 'norm1_b': jnp.zeros((TDIM,)),
            'cross_t2i': attn_params(TDIM, TDIM // 2),
            'norm2_g': jnp.ones((TDIM,)), 'norm2_b': jnp.zeros((TDIM,)),
            'mlp_w1': nrm((TDIM, DEC_MLP)), 'mlp_b1': jnp.zeros((DEC_MLP,)),
            'mlp_w2': nrm((DEC_MLP, TDIM)), 'mlp_b2': jnp.zeros((TDIM,)),
            'norm3_g': jnp.ones((TDIM,)), 'norm3_b': jnp.zeros((TDIM,)),
            'cross_i2t': attn_params(TDIM, TDIM // 2),
            'norm4_g': jnp.ones((TDIM,)), 'norm4_b': jnp.zeros((TDIM,))})
    dec = {'transformer': {'layers': layers,
                           'final_attn': attn_params(TDIM, TDIM // 2),
                           'norm_final_g': jnp.ones((TDIM,)),
                           'norm_final_b': jnp.zeros((TDIM,))},
           'iou_token': nrm((1, TDIM)),
           'mask_tokens': nrm((NUM_MASK_TOKENS, TDIM)),
           'up1_w': nrm((TDIM, TDIM // 4, 2, 2)), 'up1_b': jnp.zeros((TDIM // 4,)),
           'up_ln_g': jnp.ones((TDIM // 4,)), 'up_ln_b': jnp.zeros((TDIM // 4,)),
           'up2_w': nrm((TDIM // 4, TDIM // 8, 2, 2)), 'up2_b': jnp.zeros((TDIM // 8,)),
           'hyper': mlp3_grouped(NUM_MASK_TOKENS, TDIM, TDIM, TDIM // 8),
           'iou_head': mlp3(TDIM, IOU_HIDDEN, NUM_MASK_TOKENS)}
    P['decoder'] = dec
    return P


# ----------------------------- main -------------------------------------------
if __name__ == "__main__":
    root = jax.random.PRNGKey(0)
    k_img0, k_img1, k_pts0, k_pts1, k_par = jax.random.split(root, 5)
    params = init_params(k_par)

    H0, W0 = 48, 40   # original image size (non-square to exercise pad + crop)
    img0 = jax.random.uniform(k_img0, (3, H0, W0), jnp.float32, 0.0, 255.0)
    img1 = jax.random.uniform(k_img1, (3, H0, W0), jnp.float32, 0.0, 255.0)

    pts0 = jax.random.uniform(k_pts0, (3, 2, 2), jnp.float32, 0.0, IMG_SIZE - 1)
    pts1 = jax.random.uniform(k_pts1, (3, 2, 2), jnp.float32, 0.0, IMG_SIZE - 1)
    lbl0 = np.array([[1, 0], [-1, -1], [1, -1]], dtype=np.int32)  # prompt 1 all-ignore
    lbl1 = np.array([[1, 1], [0, 1], [1, -1]], dtype=np.int32)

    batched_input = [
        {'image': img0, 'original_size': (H0, W0),
         'point_coords': np.asarray(pts0), 'point_labels': lbl0},
        {'image': img1, 'original_size': (H0, W0),
         'point_coords': np.asarray(pts1), 'point_labels': lbl1},
    ]

    outputs = vista2d_forward(batched_input, params,
                              multimask_output=False, is_train=False)
    jax.block_until_ready(outputs)

    # light sanity checks on output contract
    assert outputs[0]['masks'].shape == (3, 1, H0, W0)
    assert outputs[0]['masks'].dtype == jnp.bool_
    assert outputs[0]['low_res_logits'].shape == (3, 1, LOW_RES, LOW_RES)
    assert outputs[0]['low_res_logits'].dtype == jnp.float16
    assert outputs[0]['iou_predictions'].shape == (2, 1)   # only valid prompts decoded
    assert outputs[1]['iou_predictions'].shape == (3, 1)
    assert outputs[0]['high_res_logits'].shape == (3, 1, H0, W0)

    print("KERNEL_OK")
</pallas_src>

<mosaic_0001>
module attributes {stable_mosaic.version = 11 : i64} {
  func.func @_preproc_kernel(%arg0: i32, %arg1: memref<1x48x48xf32, #tpu.memory_space<vmem>>, %arg2: memref<64x48xf32, #tpu.memory_space<vmem>>, %arg3: memref<48x64xf32, #tpu.memory_space<vmem>>, %arg4: memref<6xf32, #tpu.memory_space<smem>>, %arg5: memref<6xf32, #tpu.memory_space<smem>>, %arg6: memref<1x64x64xf32, #tpu.memory_space<vmem>>) attributes {dimension_semantics = [#tpu.dimension_semantics<parallel>], iteration_bounds = array<i64: 6>, scalar_prefetch = 0 : i64, scratch_operands = 0 : i64, tpu.core_type = #tpu.core_type<tc>, window_params = [{transform_indices = @transform_0, window_bounds = array<i64: 1, 48, 48>}, {pipeline_mode = #tpu.pipeline_mode<synchronous>, transform_indices = @transform_1, window_bounds = array<i64: 64, 48>}, {pipeline_mode = #tpu.pipeline_mode<synchronous>, transform_indices = @transform_2, window_bounds = array<i64: 48, 64>}, {transform_indices = @transform_3, window_bounds = array<i64: 6>}, {transform_indices = @transform_4, window_bounds = array<i64: 6>}, {transform_indices = @transform_5, window_bounds = array<i64: 1, 64, 64>}]} {
    %c0 = arith.constant 0 : index
    %c0_0 = arith.constant 0 : index
    %c0_1 = arith.constant 0 : index
    %0 = vector.load %arg1[%c0, %c0_0, %c0_1] : memref<1x48x48xf32, #tpu.memory_space<vmem>>, vector<1x48x48xf32>
    %1 = vector.shape_cast %0 : vector<1x48x48xf32> to vector<48x48xf32>
    %2 = tpu.iota {dimensions = array<i32: 0>} : vector<48x48xi32>
    %3 = tpu.iota {dimensions = array<i32: 1>} : vector<48x48xi32>
    %c48_i32 = arith.constant 48 : i32
    %4 = vector.broadcast %c48_i32 : i32 to vector<48x48xi32>
    %5 = arith.cmpi slt, %2, %4 : vector<48x48xi32>
    %c40_i32 = arith.constant 40 : i32
    %6 = vector.broadcast %c40_i32 : i32 to vector<48x48xi32>
    %7 = arith.cmpi slt, %3, %6 : vector<48x48xi32>
    %8 = arith.andi %5, %7 : vector<48x48xi1>
    %9 = arith.extui %8 : vector<48x48xi1> to vector<48x48xi32>
    %10 = arith.sitofp %9 : vector<48x48xi32> to vector<48x48xf32>
    %11 = arith.index_cast %arg0 : i32 to index
    %12 = memref.load %arg4[%11] : memref<6xf32, #tpu.memory_space<smem>>
    %13 = vector.broadcast %12 : f32 to vector<48x48xf32>
    %14 = arith.mulf %13, %10 : vector<48x48xf32>
    %15 = arith.subf %1, %14 : vector<48x48xf32>
    %16 = arith.index_cast %arg0 : i32 to index
    %17 = memref.load %arg5[%16] : memref<6xf32, #tpu.memory_space<smem>>
    %18 = vector.broadcast %17 : f32 to vector<48x48xf32>
    %19 = arith.mulf %15, %18 : vector<48x48xf32>
    %c0_2 = arith.constant 0 : index
    %c0_3 = arith.constant 0 : index
    %20 = vector.load %arg2[%c0_2, %c0_3] : memref<64x48xf32, #tpu.memory_space<vmem>>, vector<64x48xf32>
    %cst = arith.constant dense<0.000000e+00> : vector<64x48xf32>
    %21 = tpu.matmul %20, %19, %cst {dimension_numbers = #tpu.dot_dimension_numbers<[1], [0], [0], [1], [0, 0, 1, 1], [], []>} : vector<64x48xf32>, vector<48x48xf32>, vector<64x48xf32> -> vector<64x48xf32>
    %c0_4 = arith.constant 0 : index
    %c0_5 = arith.constant 0 : index
    %22 = vector.load %arg3[%c0_4, %c0_5] : memref<48x64xf32, #tpu.memory_space<vmem>>, vector<48x64xf32>
    %cst_6 = arith.constant dense<0.000000e+00> : vector<64x64xf32>
    %23 = tpu.matmul %21, %22, %cst_6 {dimension_numbers = #tpu.dot_dimension_numbers<[1], [0], [0], [1], [0, 0, 1, 1], [], []>} : vector<64x48xf32>, vector<48x64xf32>, vector<64x64xf32> -> vector<64x64xf32>
    %c0_7 = arith.constant 0 : index
    %c0_8 = arith.constant 0 : index
    %c0_9 = arith.constant 0 : index
    %24 = vector.load %arg6[%c0_7, %c0_8, %c0_9] : memref<1x64x64xf32, #tpu.memory_space<vmem>>, vector<1x64x64xf32>
    %25 = vector.shape_cast %24 : vector<1x64x64xf32> to vector<64x64xf32>
    %26 = vector.shape_cast %23 : vector<64x64xf32> to vector<1x64x64xf32>
    tpu.vector_store %arg6[%c0_7, %c0_8, %c0_9], %26 {strides = array<i32>} : memref<1x64x64xf32, #tpu.memory_space<vmem>>, vector<1x64x64xf32>,
    return
  }
  func.func @transform_0(%arg0: i32) -> (i32, i32, i32) {
    %c0_i32 = arith.constant 0 : i32
    %c0_i32_0 = arith.constant 0 : i32
    %c0_i32_1 = arith.constant 0 : i32
    return %arg0, %c0_i32, %c0_i32_0 : i32, i32, i32
  }
  func.func @transform_1(%arg0: i32) -> (i32, i32) {
    %c0_i32 = arith.constant 0 : i32
    %c0_i32_0 = arith.constant 0 : i32
    %c0_i32_1 = arith.constant 0 : i32
    return %c0_i32, %c0_i32_0 : i32, i32
  }
  func.func @transform_2(%arg0: i32) -> (i32, i32) {
    %c0_i32 = arith.constant 0 : i32
    %c0_i32_0 = arith.constant 0 : i32
    %c0_i32_1 = arith.constant 0 : i32
    return %c0_i32, %c0_i32_0 : i32, i32
  }
  func.func @transform_3(%arg0: i32) -> i32 {
    %c0_i32 = arith.constant 0 : i32
    %c0_i32_0 = arith.constant 0 : i32
    return %c0_i32 : i32
  }
  func.func @transform_4(%arg0: i32) -> i32 {
    %c0_i32 = arith.constant 0 : i32
    %c0_i32_0 = arith.constant 0 : i32
    return %c0_i32 : i32
  }
  func.func @transform_5(%arg0: i32) -> (i32, i32, i32) {
    %c0_i32 = arith.constant 0 : i32
    %c0_i32_0 = arith.constant 0 : i32
    %c0_i32_1 = arith.constant 0 : i32
    return %arg0, %c0_i32, %c0_i32_0 : i32, i32, i32
  }
}

</mosaic_0001>

<bundles_post_ra>
// kernel: tile.18
= control target key start
LH: loop header
LB: loop body
LE: loop exit
PB: predicated region body
PF: predicated region fallthrough
CT: control target
= control target key end

     0   :  { %s22_s0 = inlined_call_operand.vmem [shape: f32[3], index: 0, kind: input, shape index: {}]   ;;  %s23_s1 = inlined_call_operand.vmem [shape: f32[2,3], index: 1, kind: output, shape index: {}]  }
   0x1   :  { %v4_v0 = vld [vmem:[%s22_s0] ss:$0 sm:$0xff] }
   0x2   :  { %5 = vst [vmem:[%s23_s1] sm:$0x3] %v4_v0 }

// kernel: tile.19
= control target key start
LH: loop header
LB: loop body
LE: loop exit
PB: predicated region body
PF: predicated region fallthrough
CT: control target
= control target key end

     0   :  { %vm7_vm0 = vcmask 23552   ;;  %vm13_vm1 = vcmask 48152   ;;  %s39_s0 = inlined_call_operand.vmem [shape: f32[2,3], index: 0, kind: input, shape index: {}]   ;;  %s40_s1 = inlined_call_operand.vmem [shape: f32[6], index: 1, kind: output, shape index: {}]  }
   0x1   :  { %v4_v0 = vld [vmem:[%s39_s0] sm:$0x3]  ;;  %s22_s0 = smov 3  }
   0x2   :  { %5 = vst [vmem:[#allocation1] sm:$0x3] %v4_v0 }
   0x9   :  { %v10_v1 = vld [vmem:[#allocation1 + $0x1] sm:$0x1]   ;;  %v6_v2 = vld [vmem:[#allocation1] sm:$0x1]  }
   0xa   :  { %11 = vrot.lane.b32.xlu0 %v10_v1, %s22_s0  ;;  %8 = vst.msk [vmem:[#allocation0] sm:$0x1] %vm7_vm0, %v6_v2  }
  0x7c   :  { %v12_v3 = vpop.permute.xlu0 %11  }
  0x7d   :  { %14 = vst.msk [vmem:[#allocation0] sm:$0x1] %vm13_vm1, %v12_v3  }
  0x84   :  { %v17_v4 = vld [vmem:[#allocation0] sm:$0x1] }
  0x85   :  { %20 = vst [vmem:[%s40_s1] sm:$0x1] %v17_v4 }

// kernel: _preprocess_jit.1
= control target key start
LH: loop header
LB: loop body
LE: loop exit
PB: predicated region body
PF: predicated region fallthrough
CT: control target
= control target key end

     0   :  { %10 = vsyncpa [#allocation4], 0  ;;  %s987_s0 = inlined_call_operand.vmem [shape: f32[6,48,48], index: 0, kind: input, shape index: {}]   ;;  %s988_s1 = inlined_call_operand.vmem [shape: f32[64,48], index: 1, kind: input, shape index: {}]   ;;  %s989_s2 = inlined_call_operand.vmem [shape: f32[48,64], index: 2, kind: input, shape index: {}]   ;;  %s990_s3 = inlined_call_operand.vmem [shape: f32[6], index: 3, kind: input, shape index: {}]   ;;  %s991_s4 = inlined_call_operand.vmem [shape: f32[6], index: 4, kind: input, shape index: {}]   ;;  %s992_s5 = inlined_call_operand.hbm [shape: f32[6,64,64], index: 5, kind: output, shape index: {}]  }
   0x1   :  { %11 = vsyncpa [#allocation6], 0 }
   0x2   :  { %12 = vsyncpa [#allocation3], 0 }
   0x3   :  { %14 = vsyncpa [#allocation3 + $0x1], 0  ;;  %s817_s18 = smov 0   ;;  %s819_s19 = smov 0  }
   0x4   :  { %s821_s20 = smov 0   ;;  %s823_s21 = smov 0  }
   0x5 LB: > { %s838_s22 = sadd.s32 4294967295, %s780_s21   ;;  %s566_s23 = sadd.s32 4294967294, %s780_s21   ;;  %s780_s21 = sphi %s823_s21, %s998_s21   ;;  %s776_s20 = sphi %s821_s20, %s997_s20   ;;  %s772_s19 = sphi %s819_s19, %s996_s19   ;;  %s768_s18 = sphi %s817_s18, %s995_s18  }
   0x6   : > { %s842_s24 = sadd.s32 1, %s780_s21   ;;  %s137_s25 = sadd.s32 1, %s776_s20 }
   0x7   : > { %s134_s26 = ssub.s32 %s780_s21, %s842_s24  ;;  %p147_p0 = scmp.ne.s32.totalorder %s776_s20, %s772_s19 }
   0x8   : > { %p135_p1 = scmp.eq.s32.totalorder %s134_s26, 0  ;;  %p148_p2 = scmp.eq.s32.totalorder %s838_s22, 5 }
   0x9   : > { %p153_p3 = scmp.ne.s32.totalorder %s772_s19, %s768_s18  ;;  %p154_p4 = scmp.eq.s32.totalorder %s566_s23, 5 }
   0xa   : > { %s853_s27 = scalar_select %p135_p1, %s776_s20, %s137_s25  }
   0xb   : > { %p855_p5 = por %p148_p2, %p147_p0  ;;  %p859_p6 = por %p154_p4, %p153_p3 }
   0xc   : > { %p567_p7 = scmp.ge.s32.totalorder %s780_s21, 1  ;;  %p161_p8 = scmp.lt.s32.totalorder %s780_s21, 7 }
   0xd   : > { %p638_p9 = scmp.eq.s32.totalorder %s838_s22, 0  ;;  %s179_s7 = sshll.u32 %s990_s3, 4  ;;  %s180_s7 = int_to_ptr.vmem [resolvable:$true] %s179_s7 }
   0xe   : > { %p162_p10 = pnand %p567_p7, %p161_p8  ;;  %s189_s10 = sshll.u32 %s991_s4, 4  ;;  %s190_s10 = int_to_ptr.vmem [resolvable:$true] %s189_s10 }
   0xf   : > { %s782_s11 = smov [#allocation2]   ;;  %s783_s12 = smov [#allocation5]  }
  0x10   : > { %p627_p11 = pneg %p162_p10 }
  0x11   : > { %210 = sbr.rel (%p162_p10) target bundleno = 343 (0x157), region = 40 }
  0x12   : > { %p628_p12 = pnand %p638_p9, %p627_p11 }
  0x14   : > { %630 = dma.vmem_to_smem (!%p628_p12), %s180_s7, 16, %s782_s11, [#allocation4]  }
  0x15   : > { %633 = dma.vmem_to_smem (!%p628_p12), %s190_s10, 16, %s783_s12, [#allocation6]  }
  0x16   : > { %755 = dma.done.wait (%p638_p9), [#allocation4], 16  }
  0x17   : > { %757 = vsyncadd (%p638_p9), [#allocation4], 4294967280 }
  0x18   : > { %759 = dma.done.wait (%p638_p9), [#allocation6], 16  }
  0x19   : > { %761 = vsyncadd (%p638_p9), [#allocation6], 4294967280 }
  0x1a   : > { %222 = sfence }
  0x1b   : > { %p245_p13 = scmp.lt.s32.totalorder %s838_s22, 5  ;;  %v263_v0 = vlaneseq  ;;  %s290_s13 = sld [smem:[#allocation2 + %s838_s22]]  ;;  %v784_v2 = vmov 0.0   ;;  %v391_v23 = vld [vmem:[%s989_s2 + $0x28] sm:$0xff]  ;;  %v390_v25 = vld [vmem:[%s989_s2 + $0x20] sm:$0xff]  ;;  %v389_v27 = vld [vmem:[%s989_s2 + $0x18] sm:$0xff] }
  0x1c   : > { %s304_s14 = sld [smem:[#allocation5 + %s838_s22]]  ;;  %610 = vmatpush.msra.mxu3 %v391_v23  ;;  %426 = vmatpush.msra.mxu1 %v391_v23  ;;  %v316_v28 = vld [vmem:[%s988_s1 + $0x20] sm:$0xff]  ;;  %vm320_vm1 = vcmask 392192   ;;  %v388_v30 = vld [vmem:[%s989_s2 + $0x10] sm:$0xff]  ;;  %v387_v31 = vld [vmem:[%s989_s2 + $0x8] sm:$0xff]  ;;  %vm457_vm2 = vcmask 523264  }
  0x1d   : > { %s246_s15 = scalar_select %p245_p13, %s838_s22, 5  ;;  %v264_v1 = vand.u32 127, %v263_v0  ;;  %v312_v29 = vld [vmem:[%s988_s1] sm:$0xff]  ;;  %v317_v32 = vld [vmem:[%s988_s1 + $0x28] sm:$0xff]  ;;  %v318_v34 = vld [vmem:[%s988_s1 + $0x30] sm:$0xff] }
  0x1e   : > { %611 = vmatpush.msra.mxu3 %v390_v25  ;;  %427 = vmatpush.msra.mxu1 %v390_v25  ;;  %v313_v33 = vld [vmem:[%s988_s1 + $0x8] sm:$0xff]  ;;  %v314_v35 = vld [vmem:[%s988_s1 + $0x10] sm:$0xff]  ;;  %v319_v36 = vld [vmem:[%s988_s1 + $0x38] sm:$0xff] }
  0x1f   : > { %s616_s16 = smul.u32 48, %s246_s15  ;;  %vm271_vm0 = vcmp.lt.s32.totalorder %v264_v1, 40  ;;  %v315_v37 = vld [vmem:[%s988_s1 + $0x18] sm:$0xff]  ;;  %v386_v38 = vld [vmem:[%s989_s2] sm:$0xff] }
  0x20   : > { %v576_v3 = vsel %vm271_vm0, 1.0, %v784_v2  ;;  %612 = vmatpush.msra.mxu3 %v389_v27  ;;  %428 = vmatpush.msra.mxu1 %v389_v27 }
  0x21   : > { %s249_s25 = scalar_lea.vmem %s987_s0, %s616_s16  ;;  %v291_v4 = vstv %s290_s13  ;;  %s242_s16 = sand.u32 1, %s772_s19  }
  0x22   : > { %v255_v5 = vld [vmem:[%s249_s25 + $0x28] sm:$0xff]  ;;  %v292_v6 = vmul.f32 %v576_v3, %v291_v4  ;;  %v254_v7 = vld [vmem:[%s249_s25 + $0x20] sm:$0xff]  ;;  %v253_v8 = vld [vmem:[%s249_s25 + $0x18] sm:$0xff]  ;;  %v305_v9 = vstv %s304_s14  ;;  %613 = vmatpush.msra.mxu3 %v388_v30  ;;  %429 = vmatpush.msra.mxu1 %v388_v30  ;;  %s574_s17 = sshll.u32 %s242_s16, 6  ;;  %s467_s9 = scalar_lea.sflag [#allocation3], %s242_s16 }
  0x23   : > { %v252_v10 = vld [vmem:[%s249_s25 + $0x10] sm:$0xff]  ;;  %v251_v14 = vld [vmem:[%s249_s25 + $0x8] sm:$0xff]  ;;  %v250_v18 = vld [vmem:[%s249_s25] sm:$0xff]  ;;  %s244_s23 = scalar_lea.vmem [#allocation7], %s574_s17  ;;  %s603_s25 = sshll.u32 %s838_s22, 6 }
  0x24   : > { %v303_v11 = vsub.f32 %v255_v5, %v292_v6  ;;  %v302_v12 = vsub.f32 %v254_v7, %v292_v6  ;;  %v301_v13 = vsub.f32 %v253_v8, %v292_v6  ;;  %v300_v17 = vsub.f32 %v252_v10, %v292_v6  ;;  %614 = vmatpush.msra.mxu3 %v387_v31  ;;  %s478_s6 = scalar_lea.hbm %s992_s5, %s603_s25  ;;  %s479_s7 = sshll.u32 %s244_s23, 4  ;;  %s480_s7 = int_to_ptr.vmem [resolvable:$true] %s479_s7 }
  0x25   : > { %v299_v20 = vsub.f32 %v251_v14, %v292_v6  ;;  %v298_v22 = vsub.f32 %v250_v18, %v292_v6  ;;  %430 = vmatpush.msra.mxu1 %v387_v31  ;;  %s481_s8 = sshll.u32 %s478_s6, 4  ;;  %s730_s13 = scalar_lea.hbm %s992_s5, 384  ;;  %s482_s8 = int_to_ptr.hbm [resolvable:$true] %s481_s8 }
  0x26   : > { %v311_v15 = vmul.f32 %v305_v9, %v303_v11  ;;  %v310_v16 = vmul.f32 %v305_v9, %v302_v12  ;;  %v309_v19 = vmul.f32 %v305_v9, %v301_v13  ;;  %v308_v21 = vmul.f32 %v305_v9, %v300_v17  ;;  %615 = vmatpush.msra.mxu3 %v386_v38  ;;  %s724_s10 = sshra.s32 %s482_s8, 4  ;;  %s725_s10 = int_to_ptr.hbm [resolvable:$true] %s724_s10 }
  0x27   : > { %v307_v24 = vmul.f32 %v305_v9, %v299_v20  ;;  %v306_v26 = vmul.f32 %v305_v9, %v298_v22  ;;  %431 = vmatpush.msra.mxu1 %v386_v38  ;;  %s726_s11 = scalar_lea.hbm %s725_s10, 64  ;;  %p731_p3 = scmp.lt.s32.totalorder %s725_s10, %s992_s5 }
  0x28   : > { %604 = vmatpush.msra.mxu2 %v311_v15  ;;  %355 = vmatpush.msra.mxu0 %v311_v15  ;;  %p727_p0 = scmp.ne.s32.totalorder %s725_s10, %s726_s11  ;;  %p732_p4 = scmp.lt.s32.totalorder %s730_s13, %s726_s11 }
  0x2a   : > { %605 = vmatpush.msra.mxu2 %v310_v16  ;;  %356 = vmatpush.msra.mxu0 %v310_v16  ;;  %p728_p1 = pnand %p727_p0, %p855_p5  ;;  %p733_p7 = por %p732_p4, %p731_p3 }
  0x2c   : > { %606 = vmatpush.msra.mxu2 %v309_v19  ;;  %357 = vmatpush.msra.mxu0 %v309_v19  ;;  %p729_p2 = pneg %p728_p1 }
  0x2e   : > { %607 = vmatpush.msra.mxu2 %v308_v21  ;;  %358 = vmatpush.msra.mxu0 %v308_v21  ;;  %p734_p8 = pnand %p733_p7, %p729_p2 }
  0x30   : > { %608 = vmatpush.msra.mxu2 %v307_v24  ;;  %359 = vmatpush.msra.mxu0 %v307_v24 }
  0x32   : > { %609 = vmatpush.msra.mxu2 %v306_v26  ;;  %360 = vmatpush.msra.mxu0 %v306_v26 }
  0x33   : > { %586 = vmatmul.msk.f32.vlgmr.msra.gmra.mxu2 %vm320_vm1, %v316_v28  ;;  %582 = vmatmul.msk.f32.vlgmr.msra.gmra.mxu0 %vm320_vm1, %v312_v29 }
  0x3b   : > { %587 = vmatmul.msk.f32.gmra.mxu2 %vm320_vm1, %v317_v32  ;;  %583 = vmatmul.msk.f32.gmra.mxu0 %vm320_vm1, %v313_v33 }
  0x43   : > { %588 = vmatmul.msk.f32.gmra.mxu2 %vm320_vm1, %v318_v34  ;;  %584 = vmatmul.msk.f32.gmra.mxu0 %vm320_vm1, %v314_v35 }
  0x4b   : > { %589 = vmatmul.msk.f32.gmra.mxu2 %vm320_vm1, %v319_v36  ;;  %585 = vmatmul.msk.f32.gmra.mxu0 %vm320_vm1, %v315_v37 }
  0xb0   : > { %v362_v39 = vpop.f32.mrf.mxu0 }
  0xb1   : > { %590 = vmatmul.msk.f32.vlgmr.msra.gmra.mxu1 %vm320_vm1, %v362_v39 }
  0xb6   : > { %v374_v40 = vpop.f32.mrf.mxu2 }
  0xb7   : > { %594 = vmatmul.msk.f32.vlgmr.msra.gmra.mxu3 %vm320_vm1, %v374_v40 }
  0xb8   : > { %v365_v41 = vpop.f32.mrf.mxu0 }
  0xb9   : > { %591 = vmatmul.msk.f32.gmra.mxu1 %vm320_vm1, %v365_v41 }
  0xbe   : > { %v377_v42 = vpop.f32.mrf.mxu2 }
  0xbf   : > { %595 = vmatmul.msk.f32.gmra.mxu3 %vm320_vm1, %v377_v42 }
  0xc0   : > { %v368_v43 = vpop.f32.mrf.mxu0 }
  0xc1   : > { %592 = vmatmul.msk.f32.gmra.mxu1 %vm320_vm1, %v368_v43 }
  0xc6   : > { %v380_v44 = vpop.f32.mrf.mxu2 }
  0xc7   : > { %596 = vmatmul.msk.f32.gmra.mxu3 %vm320_vm1, %v380_v44 }
  0xc8   : > { %v371_v45 = vpop.f32.mrf.mxu0 }
  0xc9   : > { %593 = vmatmul.msk.f32.gmra.mxu1 %vm320_vm1, %v371_v45 }
  0xce   : > { %v383_v46 = vpop.f32.mrf.mxu2 }
  0xcf   : > { %597 = vmatmul.msk.f32.gmra.mxu3 %vm320_vm1, %v383_v46 }
 0x12e   : > { %v433_v47 = vpop.f32.mrf.mxu1 }
 0x12f   : > { %458 = vst.msk [vmem:[%s244_s23] sm:$0xff] %vm457_vm2, %v433_v47 }
 0x136   : > { %v436_v48 = vpop.f32.mrf.mxu1 }
 0x137   : > { %459 = vst.msk [vmem:[%s244_s23 + $0x8] sm:$0xff] %vm457_vm2, %v436_v48 }
 0x13a   : > { %v445_v49 = vpop.f32.mrf.mxu3 }
 0x13b   : > { %462 = vst.msk [vmem:[%s244_s23 + $0x20] sm:$0xff] %vm457_vm2, %v445_v49 }
 0x13e   : > { %v439_v50 = vpop.f32.mrf.mxu1 }
 0x13f   : > { %460 = vst.msk [vmem:[%s244_s23 + $0x10] sm:$0xff] %vm457_vm2, %v439_v50 }
 0x142   : > { %v448_v51 = vpop.f32.mrf.mxu3 }
 0x143   : > { %463 = vst.msk [vmem:[%s244_s23 + $0x28] sm:$0xff] %vm457_vm2, %v448_v51 }
 0x146   : > { %v442_v52 = vpop.f32.mrf.mxu1 }
 0x147   : > { %461 = vst.msk [vmem:[%s244_s23 + $0x18] sm:$0xff] %vm457_vm2, %v442_v52 }
 0x14a   : > { %v451_v53 = vpop.f32.mrf.mxu3 }
 0x14b   : > { %464 = vst.msk [vmem:[%s244_s23 + $0x30] sm:$0xff] %vm457_vm2, %v451_v53 }
 0x152   : > { %v454_v54 = vpop.f32.mrf.mxu3 }
 0x153   : > { %465 = vst.msk [vmem:[%s244_s23 + $0x38] sm:$0xff] %vm457_vm2, %v454_v54 }
 0x154   : > { %737 = shalt.err (!%p734_p8)
}
 0x155   : > { %s785_s16 = smov 128   ;;  %s786_s17 = smov 8  }
 0x156   : > { %625 = dma.vmem_to_hbm [thread:$0]  (%p855_p5), %s480_s7, 1024, %s482_s8, %s467_s9, %s785_s16, %s785_s16, %s786_s17  }
 0x157 PF: > { %p642_p9 = scmp.ge.s32.totalorder %s780_s21, 2  ;;  %s496_s23 = sand.u32 1, %s768_s18  }
 0x158   : > { %s497_s25 = scalar_lea.sflag [#allocation3], %s496_s23 }
 0x159   : > { %p635_p10 = pnand %p642_p9, %p859_p6 }
 0x15b   : > { %p636_p11 = pneg %p635_p10 }
 0x15d   : > { %763 = dma.done.wait (%p636_p11), %s497_s25, 1024  }
 0x15e   : > { %765 = vsyncadd (%p636_p11), %s497_s25, 4294966272  ;;  %p17_p12 = scmp.ge.s32.totalorder %s842_s24, 8   ;;  %s995_s18 = smov %s772_s19 }
 0x15f   : > { %s996_s19 = smov %s776_s20  ;;  %s997_s20 = smov %s853_s27 }
 0x160   : > { %s998_s21 = smov %s842_s24  ;;  %19 = sbr.rel (!%p17_p12) target bundleno = 5 (0x5), region = 84 }
 0x165   :  { %503 = vsyncpa [#allocation3], 1 }
 0x166   :  { %505 = vsyncpa [#allocation3 + $0x1], 1 }
 0x167   :  { %506 = vsyncpa [#allocation4], 1 }
 0x168   :  { %508 = vsyncpa [#allocation4 + $0x1], 1 }
 0x169   :  { %509 = vsyncpa [#allocation6], 1 }

</bundles_post_ra>
